<compile_context>
chip_gen: v7x
topology: tpu7x:2x2x1
jax: 0.10.0
libtpu: 0.0.40
codegen_flags: <defaults>
</compile_context>

<pallas_src>
import jax
import jax.numpy as jnp
from jax import lax
from jax.experimental import pallas as pl
from jax.experimental.pallas import tpu as pltpu


def cam_kernel(gamma_ref, x_ref, o_ref):
    # x_ref block: (Bb, C, Npad)   gamma_ref: (1,) f32 scalar in SMEM
    gamma = gamma_ref[0]
    bb = x_ref.shape[0]

    def body(b, carry):
        x = x_ref[b]                                           # (C, Npad), native dtype

        # energy = X @ X^T without an explicit XLU transpose: contract last axes.
        energy = lax.dot_general(
            x, x, (((1,), (1,)), ((), ())),
            preferred_element_type=jnp.float32)                # (C, C) f32

        # softmax(max(energy) - energy) == exp(min(energy) - energy) / sum
        # (single row-reduction instead of two; numerically identical).
        min_e = jnp.min(energy, axis=-1, keepdims=True)
        p = jnp.exp(min_e - energy)
        denom = jnp.sum(p, axis=-1, keepdims=True)
        attention = p * pl.reciprocal(denom, approx=True)      # EUP vrcp

        # out = attention @ X  (attention cast to X's dtype so bf16 inputs run
        # the MXU at bf16 rate; f32 accumulate preserves accuracy).
        out = jnp.dot(attention.astype(x.dtype), x,
                      preferred_element_type=jnp.float32)      # (C, Npad) f32

        o_ref[b] = (gamma * out + x.astype(jnp.float32)).astype(o_ref.dtype)
        return carry

    lax.fori_loop(0, bb, body, 0, unroll=(bb <= 8))


def cam_module_new(x, gamma, *, tile_budget_bytes=4 * 1024 * 1024):
    """x: (B, C, numpath, H, W); gamma: (1,) float32."""
    B, C, P, H, W = x.shape
    N = P * H * W
    xf = x.reshape(B, C, N)

    # Lane-dense output: pad N to a multiple of 128 (zero columns are inert).
    Npad = ((N + 127) // 128) * 128
    if Npad != N:
        xf = jnp.pad(xf, ((0, 0), (0, 0), (0, Npad - N)))

    # Block Bb batches per grid step so tiny-C problems still ship large DMAs.
    itemsize = jnp.dtype(x.dtype).itemsize
    per_batch = C * Npad * itemsize
    Bb = 1
    for d in range(1, B + 1):
        if B % d == 0 and d * per_batch <= tile_budget_bytes:
            Bb = d
    grid = (B // Bb,)

    block_bytes = Bb * per_batch
    # in + out double-buffered plus headroom for f32 intermediates; stays
    # within v7x's 64 MiB physical VMEM while raising the 32 MiB scoped default
    # only when the blocks actually need it.
    vmem_limit = int(min(64 * 1024 * 1024,
                         max(32 * 1024 * 1024, 6 * block_bytes)))

    out = pl.pallas_call(
        cam_kernel,
        out_shape=jax.ShapeDtypeStruct((B, C, Npad), x.dtype),
        grid=grid,
        in_specs=[
            pl.BlockSpec(memory_space=pltpu.MemorySpace.SMEM),         # gamma scalar
            pl.BlockSpec((Bb, C, Npad), lambda b: (b, 0, 0)),          # batch-block tile
        ],
        out_specs=pl.BlockSpec((Bb, C, Npad), lambda b: (b, 0, 0)),
        compiler_params=pltpu.CompilerParams(
            dimension_semantics=("parallel",),
            vmem_limit_bytes=vmem_limit,
        ),
    )(gamma, xf)

    if Npad != N:
        out = out[:, :, :N]
    return out.reshape(B, C, P, H, W)


def cam_module_ref(x, gamma):
    """Pure-JAX reference mirroring the PyTorch forward."""
    B, C, P, H, W = x.shape
    xf = x.reshape(B, C, -1).astype(jnp.float32)
    energy = jnp.einsum("bcn,bdn->bcd", xf, xf)
    max_e = jnp.max(energy, axis=-1, keepdims=True)
    energy_new = max_e - energy
    attention = jax.nn.softmax(energy_new, axis=-1)
    out = jnp.einsum("bcd,bdn->bcn", attention, xf)
    out = out.reshape(B, C, P, H, W)
    return gamma[0] * out + x.astype(jnp.float32)


if __name__ == "__main__":
    key = jax.random.PRNGKey(0)
    B, C, P, H, W = 2, 4, 3, 16, 16          # numpath = 3 as in the module
    x = jax.random.normal(key, (B, C, P, H, W), dtype=jnp.float32)

    # Parameter initialized exactly like the PyTorch module: gamma = zeros(1)
    gamma0 = jnp.zeros((1,), dtype=jnp.float32)
    out0 = jax.block_until_ready(cam_module_new(x, gamma0))
    ref0 = cam_module_ref(x, gamma0)
    assert out0.shape == x.shape
    assert jnp.allclose(out0, ref0, atol=1e-4, rtol=1e-4)

    # Exercise the attention path with a non-zero gamma (approx reciprocal and
    # MXU accumulation order introduce small, bounded differences).
    gamma1 = jnp.array([0.5], dtype=jnp.float32)
    out1 = jax.block_until_ready(cam_module_new(x, gamma1))
    ref1 = cam_module_ref(x, gamma1)
    assert jnp.allclose(out1, ref1, atol=2e-3, rtol=2e-3)

    print("KERNEL_OK")
</pallas_src>

<mosaic_0001>
module attributes {stable_mosaic.version = 11 : i64} {
  func.func @cam_kernel(%arg0: i32, %arg1: memref<1xf32, #tpu.memory_space<smem>>, %arg2: memref<2x4x768xf32, #tpu.memory_space<vmem>>, %arg3: memref<2x4x768xf32, #tpu.memory_space<vmem>>) attributes {dimension_semantics = [#tpu.dimension_semantics<parallel>], iteration_bounds = array<i64: 1>, scalar_prefetch = 0 : i64, scratch_operands = 0 : i64, tpu.core_type = #tpu.core_type<tc>, window_params = [{transform_indices = @transform_0, window_bounds = array<i64: 1>}, {transform_indices = @transform_1, window_bounds = array<i64: 2, 4, 768>}, {transform_indices = @transform_2, window_bounds = array<i64: 2, 4, 768>}]} {
    %c0 = arith.constant 0 : index
    %0 = memref.load %arg1[%c0] : memref<1xf32, #tpu.memory_space<smem>>
    %c0_i32 = arith.constant 0 : i32
    %1 = arith.index_cast %c0_i32 : i32 to index
    %c0_0 = arith.constant 0 : index
    %c0_1 = arith.constant 0 : index
    %2 = vector.load %arg2[%1, %c0_0, %c0_1] : memref<2x4x768xf32, #tpu.memory_space<vmem>>, vector<1x4x768xf32>
    %3 = vector.shape_cast %2 : vector<1x4x768xf32> to vector<4x768xf32>
    %cst = arith.constant dense<0.000000e+00> : vector<4x4xf32>
    %4 = tpu.matmul %3, %3, %cst {dimension_numbers = #tpu.dot_dimension_numbers<[1], [1], [0], [0], [0, 0, 1, 0], [], []>} : vector<4x768xf32>, vector<4x768xf32>, vector<4x4xf32> -> vector<4x4xf32>
    %cst_2 = arith.constant dense<0x7F800000> : vector<4xf32>
    %5 = vector.multi_reduction <minimumf>, %4, %cst_2 [1] : vector<4x4xf32> to vector<4xf32>
    %6 = vector.shape_cast %5 : vector<4xf32> to vector<4x1xf32>
    %7 = vector.broadcast %6 : vector<4x1xf32> to vector<4x4xf32>
    %8 = arith.subf %7, %4 : vector<4x4xf32>
    %9 = math.exp %8 : vector<4x4xf32>
    %cst_3 = arith.constant dense<0.000000e+00> : vector<4xf32>
    %10 = vector.multi_reduction <add>, %9, %cst_3 [1] : vector<4x4xf32> to vector<4xf32>
    %11 = vector.shape_cast %10 : vector<4xf32> to vector<4x1xf32>
    %12 = tpu.reciprocal %11 {approx = true} : vector<4x1xf32> -> vector<4x1xf32>
    %13 = vector.broadcast %12 : vector<4x1xf32> to vector<4x4xf32>
    %14 = arith.mulf %9, %13 : vector<4x4xf32>
    %cst_4 = arith.constant dense<0.000000e+00> : vector<4x768xf32>
    %15 = tpu.matmul %14, %3, %cst_4 {dimension_numbers = #tpu.dot_dimension_numbers<[1], [0], [0], [1], [0, 0, 1, 1], [], []>} : vector<4x4xf32>, vector<4x768xf32>, vector<4x768xf32> -> vector<4x768xf32>
    %16 = vector.broadcast %0 : f32 to vector<4x768xf32>
    %17 = arith.mulf %16, %15 : vector<4x768xf32>
    %18 = arith.addf %17, %3 : vector<4x768xf32>
    %19 = arith.index_cast %c0_i32 : i32 to index
    %c0_5 = arith.constant 0 : index
    %c0_6 = arith.constant 0 : index
    %20 = vector.load %arg3[%19, %c0_5, %c0_6] : memref<2x4x768xf32, #tpu.memory_space<vmem>>, vector<1x4x768xf32>
    %21 = vector.shape_cast %20 : vector<1x4x768xf32> to vector<4x768xf32>
    %22 = vector.shape_cast %18 : vector<4x768xf32> to vector<1x4x768xf32>
    tpu.vector_store %arg3[%19, %c0_5, %c0_6], %22 {strides = array<i32>} : memref<2x4x768xf32, #tpu.memory_space<vmem>>, vector<1x4x768xf32>,
    %c1_i32 = arith.constant 1 : i32
    %23 = arith.index_cast %c1_i32 : i32 to index
    %c0_7 = arith.constant 0 : index
    %c0_8 = arith.constant 0 : index
    %24 = vector.load %arg2[%23, %c0_7, %c0_8] : memref<2x4x768xf32, #tpu.memory_space<vmem>>, vector<1x4x768xf32>
    %25 = vector.shape_cast %24 : vector<1x4x768xf32> to vector<4x768xf32>
    %cst_9 = arith.constant dense<0.000000e+00> : vector<4x4xf32>
    %26 = tpu.matmul %25, %25, %cst_9 {dimension_numbers = #tpu.dot_dimension_numbers<[1], [1], [0], [0], [0, 0, 1, 0], [], []>} : vector<4x768xf32>, vector<4x768xf32>, vector<4x4xf32> -> vector<4x4xf32>
    %cst_10 = arith.constant dense<0x7F800000> : vector<4xf32>
    %27 = vector.multi_reduction <minimumf>, %26, %cst_10 [1] : vector<4x4xf32> to vector<4xf32>
    %28 = vector.shape_cast %27 : vector<4xf32> to vector<4x1xf32>
    %29 = vector.broadcast %28 : vector<4x1xf32> to vector<4x4xf32>
    %30 = arith.subf %29, %26 : vector<4x4xf32>
    %31 = math.exp %30 : vector<4x4xf32>
    %cst_11 = arith.constant dense<0.000000e+00> : vector<4xf32>
    %32 = vector.multi_reduction <add>, %31, %cst_11 [1] : vector<4x4xf32> to vector<4xf32>
    %33 = vector.shape_cast %32 : vector<4xf32> to vector<4x1xf32>
    %34 = tpu.reciprocal %33 {approx = true} : vector<4x1xf32> -> vector<4x1xf32>
    %35 = vector.broadcast %34 : vector<4x1xf32> to vector<4x4xf32>
    %36 = arith.mulf %31, %35 : vector<4x4xf32>
    %cst_12 = arith.constant dense<0.000000e+00> : vector<4x768xf32>
    %37 = tpu.matmul %36, %25, %cst_12 {dimension_numbers = #tpu.dot_dimension_numbers<[1], [0], [0], [1], [0, 0, 1, 1], [], []>} : vector<4x4xf32>, vector<4x768xf32>, vector<4x768xf32> -> vector<4x768xf32>
    %38 = vector.broadcast %0 : f32 to vector<4x768xf32>
    %39 = arith.mulf %38, %37 : vector<4x768xf32>
    %40 = arith.addf %39, %25 : vector<4x768xf32>
    %41 = arith.index_cast %c1_i32 : i32 to index
    %c0_13 = arith.constant 0 : index
    %c0_14 = arith.constant 0 : index
    %42 = vector.load %arg3[%41, %c0_13, %c0_14] : memref<2x4x768xf32, #tpu.memory_space<vmem>>, vector<1x4x768xf32>
    %43 = vector.shape_cast %42 : vector<1x4x768xf32> to vector<4x768xf32>
    %44 = vector.shape_cast %40 : vector<4x768xf32> to vector<1x4x768xf32>
    tpu.vector_store %arg3[%41, %c0_13, %c0_14], %44 {strides = array<i32>} : memref<2x4x768xf32, #tpu.memory_space<vmem>>, vector<1x4x768xf32>,
    %c2_i32 = arith.constant 2 : i32
    return
  }
  func.func @transform_0(%arg0: i32) -> i32 {
    %c0_i32 = arith.constant 0 : i32
    %c0_i32_0 = arith.constant 0 : i32
    return %c0_i32 : i32
  }
  func.func @transform_1(%arg0: i32) -> (i32, i32, i32) {
    %c0_i32 = arith.constant 0 : i32
    %c0_i32_0 = arith.constant 0 : i32
    %c0_i32_1 = arith.constant 0 : i32
    return %arg0, %c0_i32, %c0_i32_0 : i32, i32, i32
  }
  func.func @transform_2(%arg0: i32) -> (i32, i32, i32) {
    %c0_i32 = arith.constant 0 : i32
    %c0_i32_0 = arith.constant 0 : i32
    %c0_i32_1 = arith.constant 0 : i32
    return %arg0, %c0_i32, %c0_i32_0 : i32, i32, i32
  }
}

</mosaic_0001>

<bundles_post_ra>
// kernel: tpu_custom_call.1
= control target key start
LH: loop header
LB: loop body
LE: loop exit
PB: predicated region body
PF: predicated region fallthrough
CT: control target
= control target key end

     0   :  { %8 = vsyncpa [#allocation4], 0  ;;  %s1299_s0 = inlined_call_operand.<no memory space> [shape: f32[1], index: 0, kind: input, shape index: {}]   ;;  %s1300_s1 = inlined_call_operand.hbm [shape: f32[2,4,768], index: 1, kind: input, shape index: {}]   ;;  %s1301_s2 = inlined_call_operand.hbm [shape: f32[2,4,768], index: 2, kind: output, shape index: {}]  }
   0x1   :  { %9 = vsyncpa [#allocation5], 0  ;;  %s1120_s9 = smov [#allocation3]   ;;  %s1072_s13 = scalar_lea.hbm %s1300_s1, 768 }
   0x2   :  { %s17_s10 = sshll.u32 %s1120_s9, 4  ;;  %p1073_p0 = scmp.ne.s32.totalorder %s1300_s1, %s1072_s13  ;;  %s18_s10 = int_to_ptr.vmem [resolvable:$true] %s17_s10 }
   0x3   :  { %p1076_p1 = scmp.lt.u32.totalorder %s1072_s13, %s1300_s1 }
   0x5   :  { %p1078_p2 = pnand %p1076_p1, %p1073_p0 }
   0x7   :  { %1081 = shalt.err (!%p1078_p2)
}
   0x8   :  { %s1082_s18 = scalar_lea.vmem %s18_s10, 768  ;;  %p1087_p4 = scmp.lt.s32.totalorder %s18_s10, %s18_s10 }
   0x9   :  { %p1083_p3 = scmp.ne.s32.totalorder %s18_s10, %s1082_s18  ;;  %p1088_p5 = scmp.lt.s32.totalorder %s1082_s18, %s1082_s18 }
   0xb   :  { %p1089_p6 = por %p1088_p5, %p1087_p4 }
   0xd   :  { %p1090_p7 = pnand %p1089_p6, %p1083_p3 }
   0xf   :  { %1093 = shalt.err (!%p1090_p7)
}
  0x10   :  { %s1121_s19 = smov 384   ;;  %s1122_s20 = smov 24  }
  0x11   :  { %23 = dma.hbm_to_vmem [thread:$0]  %s1300_s1, 768, %s18_s10, [#allocation4], %s1121_s19, %s1121_s19, %s1122_s20  }
  0x12   :  { %1116 = dma.done.wait [#allocation4], 768  }
  0x13   :  { %1117 = vsyncadd [#allocation4], 4294966528  ;;  %v1155_v0 = vld [vmem:[#allocation3] sm:$0xff]  ;;  %v1157_v1 = vld [vmem:[#allocation3 + $0x8] sm:$0xff]  ;;  %vm250_vm0 = vcmask 27648   ;;  %vm266_vm1 = vcmask 1043456   ;;  %v1245_v24 = vstv %s1299_s0 }
  0x14   :  { %v1161_v2 = vcombine.high %v1155_v0, %v1155_v0  ;;  %v1165_v3 = vcombine.high %v1157_v1, %v1157_v1  ;;  %v1167_v4 = vld [vmem:[#allocation3 + $0x10] sm:$0xff]  ;;  %v1123_v14 = vmov 0.0   ;;  %v1195_v15 = vld [vmem:[#allocation3 + $0x18] sm:$0xff]  ;;  %v1205_v17 = vld [vmem:[#allocation3 + $0x20] sm:$0xff]  ;;  %vm262_vm2 = vcmask 31744   ;;  %s1124_s0 = smov [#allocation6]  }
  0x15   :  { %v1175_v5 = vcombine.high %v1167_v4, %v1167_v4  ;;  %343 = vmatprep.mubr.f32.mxu1 %v1123_v14  ;;  %v1199_v16 = vcombine.high %v1195_v15, %v1195_v15  ;;  %v1209_v18 = vcombine.high %v1205_v17, %v1205_v17  ;;  %v1226_v22 = vld [vmem:[#allocation3 + $0x28] sm:$0xff]  ;;  %s1015_s24 = sshll.u32 %s1124_s0, 4  ;;  %s1016_s24 = int_to_ptr.vmem [resolvable:$true] %s1015_s24 }
  0x16   :  { %40 = vmatprep.subr.mxu0 %v1161_v2  ;;  %104 = vmatprep.mubr.f32.mxu0 %v1161_v2  ;;  %v1232_v23 = vcombine.high %v1226_v22, %v1226_v22  ;;  %s1094_s25 = scalar_lea.vmem %s1016_s24, 768  ;;  %p1099_p9 = scmp.lt.s32.totalorder %s1016_s24, %s1016_s24 }
  0x17   :  { %41 = vmatpush1.xpose.msra.mxu0 %v1155_v0  ;;  %1027 = vmatprep.subr.msk.mxu1 %vm266_vm1, %v1161_v2  ;;  %p1095_p8 = scmp.ne.s32.totalorder %s1016_s24, %s1094_s25  ;;  %p1100_p10 = scmp.lt.s32.totalorder %s1094_s25, %s1094_s25 }
  0x18   :  { %110 = vmatprep.subr.mxu0 %v1165_v3  ;;  %1028 = vmatpush1.msk.msra.mxu1 %vm266_vm1, %v1155_v0 }
  0x19   :  { %1030 = vmatprep.subr.msk.mxu1 %vm266_vm1, %v1165_v3  ;;  %p1101_p11 = por %p1100_p10, %p1099_p9 }
  0x1a   :  { %105 = vmatmul.mubr.f32.vlgmr.msra.gmra.mrb[0].mxu0 %v1155_v0 }
  0x1b   :  { %111 = vmatpush1.xpose.msra.mxu0 %v1157_v1  ;;  %174 = vmatprep.mubr.f32.mxu0 %v1165_v3  ;;  %p1102_p12 = pnand %p1101_p11, %p1095_p8 }
  0x1c   :  { %180 = vmatprep.subr.mxu0 %v1175_v5 }
  0x22   :  { %175 = vmatmul.mubr.f32.vlgmr.msra.gmra.mrb[0].mxu0 %v1157_v1 }
  0x23   :  { %181 = vmatpush1.xpose.msra.mxu0 %v1167_v4  ;;  %244 = vmatprep.mubr.f32.mxu0 %v1175_v5 }
  0x24   :  { %1036 = vmatprep.subr.msk.mxu0 %vm266_vm1, %v1199_v16 }
  0x2a   :  { %245 = vmatmul.mubr.f32.vlgmr.msra.gmra.mrb[0].mxu0 %v1167_v4 }
  0x2b   :  { %833 = vmatprep.mubr.f32.mxu0 %v1123_v14  ;;  %1037 = vmatpush1.msk.msra.mxu0 %vm266_vm1, %v1195_v15 }
  0x2c   :  { %1039 = vmatprep.subr.msk.mxu0 %vm266_vm1, %v1209_v18 }
  0xfd   :  { %v246_v6 = vpop.f32.mrb[0].mxu0 }
  0xfe   :  { %v248_v7 = vpop.f32.mrb[1].mxu0  ;;  %v251_v8 = vsel %vm250_vm0, %v246_v6, inf }
  0xff   :  { %252 = vmin.xlane.f32.xlu0 %v251_v8 }
 0x18c   :  { %v253_v9 = vpop.xlane.xlu0 %252 }
 0x18d   :  { %v254_v10 = vsub.f32 %v253_v9, %v246_v6 }
 0x18f   :  { %v255_v11 = vmul.f32 1.442695, %v254_v10 }
 0x191   :  { %1064 = vpow2.f32 %v255_v11 }
 0x19b   :  { %v1065_v12 = vpop.eup %1064 }
 0x19c   :  { %v257_v13 = vsel %vm250_vm0, %v1065_v12, 0.0 }
 0x19d   :  { %258 = vadd.xlane.f32.xlu0 %v257_v13 }
 0x22a   :  { %v259_v19 = vpop.xlane.xlu0 %258 }
 0x22b   :  { %1066 = vrcp.f32 %v259_v19 }
 0x235   :  { %v1067_v20 = vpop.eup %1066 }
 0x236   :  { %v261_v21 = vmul.f32 %v1067_v20, %v1065_v12 }
 0x238   :  { %1029 = vmatmul.mubr.msk.f32.vlgmr.msra.gmra.mrb[0].mxu1 %vm262_vm2, %v261_v21 }
 0x239   :  { %1031 = vmatpush1.msk.msra.mxu1 %vm266_vm1, %v1157_v1  ;;  %414 = vmatprep.mubr.f32.mxu1 %v1123_v14 }
 0x23a   :  { %1033 = vmatprep.subr.msk.mxu1 %vm266_vm1, %v1175_v5 }
 0x23c   :  { %1032 = vmatmul.mubr.msk.f32.vlgmr.msra.gmra.mrb[2].mxu1 %vm262_vm2, %v261_v21 }
 0x23d   :  { %1034 = vmatpush1.msk.msra.mxu1 %vm266_vm1, %v1167_v4  ;;  %485 = vmatprep.mubr.f32.mxu1 %v1123_v14 }
 0x23e   :  { %533 = vmatprep.subr.mxu1 %v1199_v16 }
 0x240   :  { %1035 = vmatmul.mubr.msk.f32.vlgmr.msra.gmra.mrb[4].mxu1 %vm262_vm2, %v261_v21 }
 0x241   :  { %597 = vmatprep.mubr.f32.mxu1 %v1199_v16 }
 0x244   :  { %534 = vmatpush1.xpose.msra.mxu1 %v1195_v15 }
 0x245   :  { %603 = vmatprep.subr.mxu1 %v1209_v18 }
 0x247   :  { %598 = vmatmul.mubr.f32.vlgmr.msra.gmra.mrb[6].mxu1 %v1195_v15 }
 0x248   :  { %604 = vmatpush1.xpose.msra.mxu1 %v1205_v17  ;;  %667 = vmatprep.mubr.f32.mxu1 %v1209_v18 }
 0x249   :  { %673 = vmatprep.subr.mxu1 %v1232_v23 }
 0x24f   :  { %668 = vmatmul.mubr.f32.vlgmr.msra.gmra.mrb[6].mxu1 %v1205_v17 }
 0x250   :  { %674 = vmatpush1.xpose.msra.mxu1 %v1226_v22  ;;  %737 = vmatprep.mubr.f32.mxu1 %v1232_v23 }
 0x257   :  { %738 = vmatmul.mubr.f32.vlgmr.msra.gmra.mrb[6].mxu1 %v1226_v22 }
 0x30b   :  { %v345_v25 = vpop.f32.mrb[0].mxu1 }
 0x30c   :  { %v493_v26 = vmul.f32 %v1245_v24, %v345_v25  ;;  %v347_v27 = vpop.f32.mrb[1].mxu1 }
 0x30d   :  { %v494_v28 = vmul.f32 %v1245_v24, %v347_v27 }
 0x30e   :  { %v499_v29 = vadd.f32 %v493_v26, %v1155_v0 }
 0x30f   :  { %v500_v30 = vadd.f32 %v494_v28, %v1161_v2  ;;  %v416_v31 = vpop.f32.mrb[2].mxu1 }
 0x310   :  { %v495_v32 = vmul.f32 %v1245_v24, %v416_v31  ;;  %v418_v33 = vpop.f32.mrb[3].mxu1 }
 0x311   :  { %v511_v34 = vcombine.low %v499_v29, %v500_v30  ;;  %v496_v35 = vmul.f32 %v1245_v24, %v418_v33 }
 0x312   :  { %v501_v36 = vadd.f32 %v495_v32, %v1157_v1 }
 0x313   :  { %517 = vst [vmem:[#allocation6] sm:$0xff] %v511_v34  ;;  %v502_v37 = vadd.f32 %v496_v35, %v1165_v3  ;;  %v487_v38 = vpop.f32.mrb[4].mxu1 }
 0x314   :  { %v497_v39 = vmul.f32 %v1245_v24, %v487_v38  ;;  %v489_v40 = vpop.f32.mrb[5].mxu1 }
 0x315   :  { %v512_v41 = vcombine.low %v501_v36, %v502_v37  ;;  %v498_v42 = vmul.f32 %v1245_v24, %v489_v40 }
 0x316   :  { %v503_v43 = vadd.f32 %v497_v39, %v1167_v4 }
 0x317   :  { %518 = vst [vmem:[#allocation6 + $0x8] sm:$0xff] %v512_v41  ;;  %v504_v44 = vadd.f32 %v498_v42, %v1175_v5 }
 0x319   :  { %v513_v45 = vcombine.low %v503_v43, %v504_v44 }
 0x31b   :  { %519 = vst [vmem:[#allocation6 + $0x10] sm:$0xff] %v513_v45 }
 0x32a   :  { %v739_v46 = vpop.f32.mrb[6].mxu1 }
 0x32b   :  { %v741_v47 = vpop.f32.mrb[7].mxu1  ;;  %v743_v48 = vsel %vm250_vm0, %v739_v46, inf }
 0x32c   :  { %744 = vmin.xlane.f32.xlu1 %v743_v48 }
 0x3b9   :  { %v745_v49 = vpop.xlane.xlu1 %744 }
 0x3ba   :  { %v746_v50 = vsub.f32 %v745_v49, %v739_v46 }
 0x3bc   :  { %v747_v51 = vmul.f32 1.442695, %v746_v50 }
 0x3be   :  { %1068 = vpow2.f32 %v747_v51 }
 0x3c8   :  { %v1069_v52 = vpop.eup %1068 }
 0x3c9   :  { %v749_v53 = vsel %vm250_vm0, %v1069_v52, 0.0 }
 0x3ca   :  { %750 = vadd.xlane.f32.xlu1 %v749_v53 }
 0x457   :  { %v751_v54 = vpop.xlane.xlu1 %750 }
 0x458   :  { %1070 = vrcp.f32 %v751_v54 }
 0x462   :  { %v1071_v55 = vpop.eup %1070 }
 0x463   :  { %v753_v56 = vmul.f32 %v1071_v55, %v1069_v52 }
 0x465   :  { %1038 = vmatmul.mubr.msk.f32.vlgmr.msra.gmra.mrb[2].mxu0 %vm262_vm2, %v753_v56 }
 0x466   :  { %1040 = vmatpush1.msk.msra.mxu0 %vm266_vm1, %v1205_v17  ;;  %904 = vmatprep.mubr.f32.mxu0 %v1123_v14 }
 0x467   :  { %1042 = vmatprep.subr.msk.mxu0 %vm266_vm1, %v1232_v23 }
 0x469   :  { %1041 = vmatmul.mubr.msk.f32.vlgmr.msra.gmra.mrb[4].mxu0 %vm262_vm2, %v753_v56 }
 0x46a   :  { %1043 = vmatpush1.msk.msra.mxu0 %vm266_vm1, %v1226_v22  ;;  %975 = vmatprep.mubr.f32.mxu0 %v1123_v14 }
 0x46d   :  { %1044 = vmatmul.mubr.msk.f32.vlgmr.msra.gmra.mrb[6].mxu0 %vm262_vm2, %v753_v56 }
 0x538   :  { %v835_v57 = vpop.f32.mrb[2].mxu0 }
 0x539   :  { %v982_v58 = vmul.f32 %v835_v57, %v1245_v24  ;;  %v837_v59 = vpop.f32.mrb[3].mxu0 }
 0x53a   :  { %v983_v60 = vmul.f32 %v837_v59, %v1245_v24 }
 0x53b   :  { %v988_v61 = vadd.f32 %v982_v58, %v1195_v15 }
 0x53c   :  { %v989_v62 = vadd.f32 %v983_v60, %v1199_v16  ;;  %v906_v63 = vpop.f32.mrb[4].mxu0 }
 0x53d   :  { %v984_v0 = vmul.f32 %v906_v63, %v1245_v24  ;;  %v908_v1 = vpop.f32.mrb[5].mxu0 }
 0x53e   :  { %v1000_v2 = vcombine.low %v988_v61, %v989_v62  ;;  %v985_v3 = vmul.f32 %v908_v1, %v1245_v24 }
 0x53f   :  { %v990_v4 = vadd.f32 %v984_v0, %v1205_v17 }
 0x540   :  { %1007 = vst [vmem:[#allocation6 + $0x18] sm:$0xff] %v1000_v2  ;;  %v991_v5 = vadd.f32 %v985_v3, %v1209_v18  ;;  %v977_v6 = vpop.f32.mrb[6].mxu0 }
 0x541   :  { %v986_v7 = vmul.f32 %v977_v6, %v1245_v24  ;;  %v979_v8 = vpop.f32.mrb[7].mxu0 }
 0x542   :  { %v1001_v9 = vcombine.low %v990_v4, %v991_v5  ;;  %v987_v10 = vmul.f32 %v979_v8, %v1245_v24 }
 0x543   :  { %v992_v11 = vadd.f32 %v986_v7, %v1226_v22 }
 0x544   :  { %1008 = vst [vmem:[#allocation6 + $0x20] sm:$0xff] %v1001_v9  ;;  %v993_v12 = vadd.f32 %v987_v10, %v1232_v23 }
 0x546   :  { %v1002_v13 = vcombine.low %v992_v11, %v993_v12 }
 0x548   :  { %1009 = vst [vmem:[#allocation6 + $0x28] sm:$0xff] %v1002_v13 }
 0x549   :  { %1105 = shalt.err (!%p1102_p12)
}
 0x54a   :  { %s1106_s28 = scalar_lea.hbm %s1301_s2, 768 }
 0x54b   :  { %p1107_p13 = scmp.ne.s32.totalorder %s1301_s2, %s1106_s28  ;;  %p1110_p0 = scmp.lt.u32.totalorder %s1106_s28, %s1301_s2 }
 0x54d   :  { %p1112_p1 = pnand %p1110_p0, %p1107_p13 }
 0x54f   :  { %1115 = shalt.err (!%p1112_p1)
}
 0x550   :  { %1021 = dma.vmem_to_hbm [thread:$0]  %s1016_s24, 768, %s1301_s2, [#allocation5], %s1121_s19, %s1121_s19, %s1122_s20  }
 0x551   :  { %1118 = dma.done.wait [#allocation5], 768  }
 0x552   :  { %1119 = vsyncadd [#allocation5], 4294966528 }
 0x553   :  { %1025 = vsyncpa [#allocation4], 1 }
 0x554   :  { %1026 = vsyncpa [#allocation5], 1 }

</bundles_post_ra>
